<compile_context>
chip_gen: v7x
topology: tpu7x:2x2x1
jax: 0.10.0
libtpu: 0.0.40
codegen_flags: <defaults>
</compile_context>

<pallas_src>
import functools
import math

import numpy as np
import jax
import jax.numpy as jnp
from jax.experimental import pallas as pl
from jax.experimental.pallas import tpu as pltpu


def _round_up(a: int, m: int) -> int:
    return ((a + m - 1) // m) * m


def _bilinear_matrix(out_size: int, in_size: int) -> np.ndarray:
    """Row-stochastic matrix W (out_size, in_size) s.t. W @ v == PyTorch
    F.interpolate(v, mode='bilinear', align_corners=False) along one axis."""
    W = np.zeros((out_size, in_size), dtype=np.float32)
    scale = in_size / out_size
    for i in range(out_size):
        src = (i + 0.5) * scale - 0.5
        if src < 0.0:          # PyTorch clamps negative source coords to 0
            src = 0.0
        x0 = int(np.floor(src))
        x0 = min(x0, in_size - 1)
        x1 = min(x0 + 1, in_size - 1)
        lam = src - x0
        W[i, x0] += 1.0 - lam
        W[i, x1] += lam
    return W


def _padded_bilinear_kron(h: int, w: int, target_size: int, pad_size: int,
                          l_pad: int) -> np.ndarray:
    """Constant (H*W, P*P) matrix folding 'bilinear resize to (T,T)' followed by
    'zero-pad to (P,P)' into a single matmul: out.flat = x.flat @ M."""
    T, P = target_size, pad_size
    wy = _bilinear_matrix(T, h)                       # (T, H)
    wx = _bilinear_matrix(T, w)                       # (T, W)
    wy_pad = np.zeros((P, h), dtype=np.float32)
    wy_pad[l_pad:l_pad + T, :] = wy                   # zero rows = top/bottom pad
    wx_pad = np.zeros((P, w), dtype=np.float32)
    wx_pad[l_pad:l_pad + T, :] = wx                   # zero rows = left/right pad
    M = np.einsum('ih,jw->hwij', wy_pad, wx_pad).reshape(h * w, P * P)
    return M.astype(np.float32)


def _evp_kernel(x_ref, m_ref, prompt_ref, o_ref):
    """One grid step = block_rows (image, channel) planes.

    x_ref      : (block_rows, H*W)   VMEM  flattened input planes
    m_ref      : (H*W, P*P)          VMEM  resize+pad matrix (resident)
    prompt_ref : (block_rows, P*P)   VMEM  sigmoid(program)*mask, channel-tiled (resident)
    o_ref      : (block_rows, P*P)   VMEM  output planes (lane-dense full-tile store)
    """
    interp_padded = jnp.dot(x_ref[...], m_ref[...],
                            preferred_element_type=jnp.float32)
    o_ref[...] = (interp_padded + prompt_ref[...]).astype(o_ref.dtype)


def expansive_visual_prompt(x, program, mask, *, pad_size: int, target_size: int,
                            l_pad: int, r_pad: int, block_rows_target: int = 384):
    """x: (b, t, d, c, h, w) float32 -> (b, t, d, c, pad_size, pad_size)."""
    b, t, d, c, h, w = x.shape
    N = b * t * d
    rows = N * c
    P = pad_size
    K = h * w
    PP = P * P

    # --- host-side precompute (hoisted out of the grid loop) ------------------
    # sigmoid(program) * mask, flattened per channel.
    prompt = (jax.nn.sigmoid(program) * mask).reshape(c, PP).astype(jnp.float32)
    # Resize+pad folded into one constant matrix.
    m = jnp.asarray(_padded_bilinear_kron(h, w, target_size, P, l_pad))

    # --- block sizing ---------------------------------------------------------
    # block_rows must be a multiple of lcm(8, c): 8 for sublane tiling, c so that
    # every block starts on a channel boundary (prompt tile alignment).
    unit = math.lcm(8, c)
    max_block = max(unit, (block_rows_target // unit) * unit)
    block_rows = min(_round_up(rows, unit), max_block)
    rows_p = _round_up(rows, block_rows)

    x_flat = x.reshape(rows, K).astype(jnp.float32)
    if rows_p != rows:
        x_flat = jnp.pad(x_flat, ((0, rows_p - rows), (0, 0)))

    # Channel-tiled prompt matching one block; constant index_map keeps it resident.
    prompt_tile = jnp.tile(prompt, (block_rows // c, 1))          # (block_rows, PP)

    grid = (rows_p // block_rows,)

    out = pl.pallas_call(
        _evp_kernel,
        out_shape=jax.ShapeDtypeStruct((rows_p, PP), x.dtype),
        grid=grid,
        in_specs=[
            pl.BlockSpec((block_rows, K), lambda r: (r, 0)),       # x planes
            pl.BlockSpec((K, PP), lambda r: (0, 0)),               # resize+pad matrix
            pl.BlockSpec((block_rows, PP), lambda r: (0, 0)),      # prompt tile
        ],
        out_specs=pl.BlockSpec((block_rows, PP), lambda r: (r, 0)),
        compiler_params=pltpu.CompilerParams(
            dimension_semantics=("parallel",),
            vmem_limit_bytes=32 * 1024 * 1024,
        ),
    )(x_flat, m, prompt_tile)

    out = out[:rows].reshape(b, t, d, c, P, P)
    return out


def _reference(x, program, mask, *, pad_size, target_size, l_pad, r_pad):
    """Pure-JAX reference via the separable interpolation path (independent of
    the kron formulation used in the kernel)."""
    b, t, d, c, h, w = x.shape
    xr = x.reshape(b * t * d, c, h, w)
    wy = jnp.asarray(_bilinear_matrix(target_size, h))
    wx = jnp.asarray(_bilinear_matrix(target_size, w))
    interp = jnp.einsum('th,nchw,sw->ncts', wy, xr, wx)
    padded = jnp.pad(interp, ((0, 0), (0, 0), (l_pad, r_pad), (l_pad, r_pad)))
    out = padded + jax.nn.sigmoid(program)[None] * mask[None]
    return out.reshape(b, t, d, c, pad_size, pad_size)


if __name__ == "__main__":
    # Small shapes consistent with the module's forward.
    b, t, d, c = 2, 2, 2, 3
    h = w = 16
    target_size = 24
    pad_size = 32
    l_pad = int((pad_size - target_size + 1) / 2)   # 4
    r_pad = int((pad_size - target_size) / 2)       # 4

    key = jax.random.PRNGKey(0)
    kx, kp = jax.random.split(key)
    x = jax.random.normal(kx, (b, t, d, c, h, w), dtype=jnp.float32)
    # init='randn' parameter, deterministic
    program = jax.random.normal(kp, (c, pad_size, pad_size), dtype=jnp.float32)
    # mask buffer: zeros(T,T) padded with value=1 -> 1 on border, 0 in center
    mask = jnp.pad(jnp.zeros((c, target_size, target_size), jnp.float32),
                   ((0, 0), (l_pad, r_pad), (l_pad, r_pad)),
                   constant_values=1.0)

    # TODO(synk): `normalize` (an arbitrary callable in the PyTorch module) is None
    # by default and is not translated.

    out = expansive_visual_prompt(x, program, mask,
                                  pad_size=pad_size, target_size=target_size,
                                  l_pad=l_pad, r_pad=r_pad)
    out = jax.block_until_ready(out)

    ref = _reference(x, program, mask, pad_size=pad_size,
                     target_size=target_size, l_pad=l_pad, r_pad=r_pad)
    assert out.shape == (b, t, d, c, pad_size, pad_size)
    np.testing.assert_allclose(np.asarray(out), np.asarray(ref),
                               rtol=1e-5, atol=1e-5)
    print("KERNEL_OK")
</pallas_src>

<mosaic_0001>
module attributes {stable_mosaic.version = 11 : i64} {
  func.func @_evp_kernel(%arg0: i32, %arg1: memref<24x256xf32, #tpu.memory_space<vmem>>, %arg2: memref<256x1024xf32, #tpu.memory_space<vmem>>, %arg3: memref<24x1024xf32, #tpu.memory_space<vmem>>, %arg4: memref<24x1024xf32, #tpu.memory_space<vmem>>) attributes {dimension_semantics = [#tpu.dimension_semantics<parallel>], iteration_bounds = array<i64: 1>, scalar_prefetch = 0 : i64, scratch_operands = 0 : i64, tpu.core_type = #tpu.core_type<tc>, window_params = [{transform_indices = @transform_0, window_bounds = array<i64: 24, 256>}, {pipeline_mode = #tpu.pipeline_mode<synchronous>, transform_indices = @transform_1, window_bounds = array<i64: 256, 1024>}, {pipeline_mode = #tpu.pipeline_mode<synchronous>, transform_indices = @transform_2, window_bounds = array<i64: 24, 1024>}, {transform_indices = @transform_3, window_bounds = array<i64: 24, 1024>}]} {
    %c0 = arith.constant 0 : index
    %c0_0 = arith.constant 0 : index
    %0 = vector.load %arg1[%c0, %c0_0] : memref<24x256xf32, #tpu.memory_space<vmem>>, vector<24x256xf32>
    %c0_1 = arith.constant 0 : index
    %c0_2 = arith.constant 0 : index
    %1 = vector.load %arg2[%c0_1, %c0_2] : memref<256x1024xf32, #tpu.memory_space<vmem>>, vector<256x1024xf32>
    %cst = arith.constant dense<0.000000e+00> : vector<24x1024xf32>
    %2 = tpu.matmul %0, %1, %cst {dimension_numbers = #tpu.dot_dimension_numbers<[1], [0], [0], [1], [0, 0, 1, 1], [], []>} : vector<24x256xf32>, vector<256x1024xf32>, vector<24x1024xf32> -> vector<24x1024xf32>
    %c0_3 = arith.constant 0 : index
    %c0_4 = arith.constant 0 : index
    %3 = vector.load %arg3[%c0_3, %c0_4] : memref<24x1024xf32, #tpu.memory_space<vmem>>, vector<24x1024xf32>
    %4 = arith.addf %2, %3 : vector<24x1024xf32>
    %c0_5 = arith.constant 0 : index
    %c0_6 = arith.constant 0 : index
    %5 = vector.load %arg4[%c0_5, %c0_6] : memref<24x1024xf32, #tpu.memory_space<vmem>>, vector<24x1024xf32>
    tpu.vector_store %arg4[%c0_5, %c0_6], %4 {strides = array<i32>} : memref<24x1024xf32, #tpu.memory_space<vmem>>, vector<24x1024xf32>,
    return
  }
  func.func @transform_0(%arg0: i32) -> (i32, i32) {
    %c0_i32 = arith.constant 0 : i32
    %c0_i32_0 = arith.constant 0 : i32
    return %arg0, %c0_i32 : i32, i32
  }
  func.func @transform_1(%arg0: i32) -> (i32, i32) {
    %c0_i32 = arith.constant 0 : i32
    %c0_i32_0 = arith.constant 0 : i32
    %c0_i32_1 = arith.constant 0 : i32
    return %c0_i32, %c0_i32_0 : i32, i32
  }
  func.func @transform_2(%arg0: i32) -> (i32, i32) {
    %c0_i32 = arith.constant 0 : i32
    %c0_i32_0 = arith.constant 0 : i32
    %c0_i32_1 = arith.constant 0 : i32
    return %c0_i32, %c0_i32_0 : i32, i32
  }
  func.func @transform_3(%arg0: i32) -> (i32, i32) {
    %c0_i32 = arith.constant 0 : i32
    %c0_i32_0 = arith.constant 0 : i32
    return %arg0, %c0_i32 : i32, i32
  }
}

</mosaic_0001>

<bundles_post_ra>
// kernel: tpu_custom_call.1
= control target key start
LH: loop header
LB: loop body
LE: loop exit
PB: predicated region body
PF: predicated region fallthrough
CT: control target
= control target key end

     0   :  { %8 = vsyncpa [#allocation3], 0  ;;  %s1195_s0 = inlined_call_operand.hbm [shape: f32[24,256], index: 0, kind: input, shape index: {}]   ;;  %s1196_s1 = inlined_call_operand.hbm [shape: f32[256,1024], index: 1, kind: input, shape index: {}]   ;;  %s1197_s2 = inlined_call_operand.hbm [shape: f32[24,1024], index: 2, kind: input, shape index: {}]   ;;  %s1198_s3 = inlined_call_operand.hbm [shape: f32[24,1024], index: 3, kind: output, shape index: {}]  }
   0x1   :  { %9 = vsyncpa [#allocation6], 0 }
   0x2   :  { %10 = vsyncpa [#allocation4], 0  ;;  %s1074_s12 = smov [#allocation5]   ;;  %s980_s16 = scalar_lea.hbm %s1196_s1, 32768 }
   0x3   :  { %s28_s13 = sshll.u32 %s1074_s12, 4  ;;  %p981_p0 = scmp.ne.s32.totalorder %s1196_s1, %s980_s16  ;;  %s29_s13 = int_to_ptr.vmem [resolvable:$true] %s28_s13 }
   0x4   :  { %p984_p1 = scmp.lt.u32.totalorder %s980_s16, %s1196_s1 }
   0x6   :  { %p986_p2 = pnand %p984_p1, %p981_p0 }
   0x8   :  { %989 = shalt.err (!%p986_p2)
}
   0x9   :  { %s990_s21 = scalar_lea.vmem %s29_s13, 32768  ;;  %p995_p4 = scmp.lt.s32.totalorder %s29_s13, %s29_s13 }
   0xa   :  { %p991_p3 = scmp.ne.s32.totalorder %s29_s13, %s990_s21  ;;  %p996_p5 = scmp.lt.s32.totalorder %s990_s21, %s990_s21 }
   0xc   :  { %p997_p6 = por %p996_p5, %p995_p4 }
   0xe   :  { %p998_p7 = pnand %p997_p6, %p991_p3 }
  0x10   :  { %1001 = shalt.err (!%p998_p7)
}
  0x11   :  { %s1075_s22 = smov 1024   ;;  %s1076_s23 = smov 64  }
  0x12   :  { %34 = dma.hbm_to_vmem [thread:$0]  %s1196_s1, 32768, %s29_s13, [#allocation6], %s1075_s22, %s1075_s22, %s1076_s23  }
  0x13   :  { %s1077_s26 = smov [#allocation2]   ;;  %s1002_s30 = scalar_lea.hbm %s1195_s0, 768 }
  0x14   :  { %s16_s27 = sshll.u32 %s1077_s26, 4  ;;  %p1003_p8 = scmp.ne.s32.totalorder %s1195_s0, %s1002_s30  ;;  %s17_s27 = int_to_ptr.vmem [resolvable:$true] %s16_s27 }
  0x15   :  { %p1006_p9 = scmp.lt.u32.totalorder %s1002_s30, %s1195_s0 }
  0x17   :  { %p1008_p10 = pnand %p1006_p9, %p1003_p8 }
  0x19   :  { %1011 = shalt.err (!%p1008_p10)
}
  0x1a   :  { %s1012_s8 = scalar_lea.vmem %s17_s27, 768  ;;  %p1017_p12 = scmp.lt.s32.totalorder %s17_s27, %s17_s27 }
  0x1b   :  { %p1013_p11 = scmp.ne.s32.totalorder %s17_s27, %s1012_s8  ;;  %p1018_p13 = scmp.lt.s32.totalorder %s1012_s8, %s1012_s8 }
  0x1d   :  { %p1019_p0 = por %p1018_p13, %p1017_p12 }
  0x1f   :  { %p1020_p1 = pnand %p1019_p0, %p1013_p11 }
  0x21   :  { %1023 = shalt.err (!%p1020_p1)
}
  0x22   :  { %s1078_s1 = smov 256   ;;  %s1079_s9 = smov 16  }
  0x23   :  { %22 = dma.hbm_to_vmem [thread:$0]  %s1195_s0, 768, %s17_s27, [#allocation3], %s1078_s1, %s1078_s1, %s1079_s9  }
  0x24   :  { %s1080_s12 = smov [#allocation7]   ;;  %s1024_s16 = scalar_lea.hbm %s1197_s2, 3072 }
  0x25   :  { %s40_s13 = sshll.u32 %s1080_s12, 4  ;;  %p1025_p2 = scmp.ne.s32.totalorder %s1197_s2, %s1024_s16  ;;  %s41_s13 = int_to_ptr.vmem [resolvable:$true] %s40_s13 }
  0x26   :  { %p1028_p3 = scmp.lt.u32.totalorder %s1024_s16, %s1197_s2 }
  0x28   :  { %p1030_p4 = pnand %p1028_p3, %p1025_p2 }
  0x2a   :  { %1033 = shalt.err (!%p1030_p4)
}
  0x2b   :  { %s1034_s21 = scalar_lea.vmem %s41_s13, 3072  ;;  %p1039_p6 = scmp.lt.s32.totalorder %s41_s13, %s41_s13 }
  0x2c   :  { %p1035_p5 = scmp.ne.s32.totalorder %s41_s13, %s1034_s21  ;;  %p1040_p7 = scmp.lt.s32.totalorder %s1034_s21, %s1034_s21 }
  0x2e   :  { %p1041_p8 = por %p1040_p7, %p1039_p6 }
  0x30   :  { %p1042_p9 = pnand %p1041_p8, %p1035_p5 }
  0x32   :  { %1045 = shalt.err (!%p1042_p9)
}
  0x33   :  { %46 = dma.hbm_to_vmem [thread:$0]  %s1197_s2, 3072, %s41_s13, [#allocation6], %s1075_s22, %s1075_s22, %s1076_s23  }
  0x34   :  { %1068 = dma.done.wait [#allocation3], 768  }
  0x35   :  { %1069 = vsyncadd [#allocation3], 4294966528 }
  0x36   :  { %1070 = dma.done.wait [#allocation6], 35840  }
  0x37   :  { %1071 = vsyncadd [#allocation6], 4294931456  ;;  %v63_v0 = vld [vmem:[#allocation5 + $0x8] sm:$0xff]  ;;  %v65_v2 = vld [vmem:[#allocation5 + $0x18] sm:$0xff]  ;;  %s1081_s2 = smov [#allocation8]  }
  0x38   :  { %v71_v1 = vld [vmem:[#allocation5 + $0x48] sm:$0xff]  ;;  %v73_v4 = vld [vmem:[#allocation5 + $0x58] sm:$0xff]  ;;  %v62_v5 = vld [vmem:[#allocation5] sm:$0xff]  ;;  %s703_s25 = sshll.u32 %s1081_s2, 4  ;;  %s704_s25 = int_to_ptr.vmem [resolvable:$true] %s703_s25 }
  0x39   :  { %v716_v3 = vpack.c.bf16 %v71_v1, %v63_v0  ;;  %v70_v6 = vld [vmem:[#allocation5 + $0x40] sm:$0xff]  ;;  %v780_v7 = vpack.c.bf16 %v73_v4, %v65_v2  ;;  %v64_v9 = vld [vmem:[#allocation5 + $0x10] sm:$0xff]  ;;  %v79_v11 = vld [vmem:[#allocation5 + $0x88] sm:$0xff]  ;;  %s1046_s26 = scalar_lea.vmem %s704_s25, 3072  ;;  %p1051_p11 = scmp.lt.s32.totalorder %s704_s25, %s704_s25 }
  0x3a   :  { %v718_v8 = vpack.c.bf16 %v70_v6, %v62_v5  ;;  %v72_v10 = vld [vmem:[#allocation5 + $0x50] sm:$0xff]  ;;  %v87_v13 = vld [vmem:[#allocation5 + $0xc8] sm:$0xff]  ;;  %v81_v14 = vld [vmem:[#allocation5 + $0x98] sm:$0xff]  ;;  %p1047_p10 = scmp.ne.s32.totalorder %s704_s25, %s1046_s26  ;;  %p1052_p12 = scmp.lt.s32.totalorder %s1046_s26, %s1046_s26 }
  0x3b   :  { %717 = vmatprep.subr.bf16.mxu0 %v716_v3  ;;  %v782_v12 = vpack.c.bf16 %v72_v10, %v64_v9  ;;  %v89_v15 = vld [vmem:[#allocation5 + $0xd8] sm:$0xff]  ;;  %781 = vmatprep.subr.bf16.mxu1 %v780_v7  ;;  %v720_v16 = vpack.c.bf16 %v87_v13, %v79_v11  ;;  %v78_v18 = vld [vmem:[#allocation5 + $0x80] sm:$0xff]  ;;  %v80_v20 = vld [vmem:[#allocation5 + $0x90] sm:$0xff] }
  0x3c   :  { %719 = vmatpush1.bf16.msra.mxu0 %v718_v8  ;;  %v784_v17 = vpack.c.bf16 %v89_v15, %v81_v14  ;;  %v86_v19 = vld [vmem:[#allocation5 + $0xc0] sm:$0xff]  ;;  %v88_v22 = vld [vmem:[#allocation5 + $0xd0] sm:$0xff]  ;;  %v95_v23 = vld [vmem:[#allocation5 + $0x108] sm:$0xff]  ;;  %p1053_p13 = por %p1052_p12, %p1051_p11 }
  0x3d   :  { %783 = vmatpush1.bf16.msra.mxu1 %v782_v12  ;;  %v722_v21 = vpack.c.bf16 %v86_v19, %v78_v18  ;;  %v103_v24 = vld [vmem:[#allocation5 + $0x148] sm:$0xff]  ;;  %721 = vmatprep.subr.bf16.mxu0 %v720_v16  ;;  %v786_v25 = vpack.c.bf16 %v88_v22, %v80_v20  ;;  %v97_v27 = vld [vmem:[#allocation5 + $0x118] sm:$0xff]  ;;  %v94_v29 = vld [vmem:[#allocation5 + $0x100] sm:$0xff] }
  0x3e   :  { %785 = vmatprep.subr.bf16.mxu1 %v784_v17  ;;  %v724_v26 = vpack.c.bf16 %v103_v24, %v95_v23  ;;  %v105_v28 = vld [vmem:[#allocation5 + $0x158] sm:$0xff]  ;;  %v102_v31 = vld [vmem:[#allocation5 + $0x140] sm:$0xff]  ;;  %v96_v32 = vld [vmem:[#allocation5 + $0x110] sm:$0xff]  ;;  %p1054_p0 = pnand %p1053_p13, %p1047_p10 }
  0x3f   :  { %v788_v30 = vpack.c.bf16 %v105_v28, %v97_v27  ;;  %v104_v33 = vld [vmem:[#allocation5 + $0x150] sm:$0xff]  ;;  %v726_v34 = vpack.c.bf16 %v102_v31, %v94_v29  ;;  %v111_v35 = vld [vmem:[#allocation5 + $0x188] sm:$0xff]  ;;  %v113_v37 = vld [vmem:[#allocation5 + $0x198] sm:$0xff] }
  0x40   :  { %723 = vmatpush1.bf16.msra.mxu0 %v722_v21  ;;  %v119_v36 = vld [vmem:[#allocation5 + $0x1c8] sm:$0xff]  ;;  %v790_v38 = vpack.c.bf16 %v104_v33, %v96_v32  ;;  %v121_v40 = vld [vmem:[#allocation5 + $0x1d8] sm:$0xff]  ;;  %v110_v41 = vld [vmem:[#allocation5 + $0x180] sm:$0xff] }
  0x41   :  { %787 = vmatpush1.bf16.msra.mxu1 %v786_v25  ;;  %725 = vmatprep.subr.bf16.mxu0 %v724_v26  ;;  %v728_v39 = vpack.c.bf16 %v119_v36, %v111_v35  ;;  %v118_v42 = vld [vmem:[#allocation5 + $0x1c0] sm:$0xff]  ;;  %v792_v43 = vpack.c.bf16 %v121_v40, %v113_v37  ;;  %v112_v44 = vld [vmem:[#allocation5 + $0x190] sm:$0xff]  ;;  %v127_v46 = vld [vmem:[#allocation5 + $0x208] sm:$0xff] }
  0x42   :  { %789 = vmatprep.subr.bf16.mxu1 %v788_v30  ;;  %v120_v45 = vld [vmem:[#allocation5 + $0x1d0] sm:$0xff]  ;;  %v135_v47 = vld [vmem:[#allocation5 + $0x248] sm:$0xff]  ;;  %v129_v48 = vld [vmem:[#allocation5 + $0x218] sm:$0xff]  ;;  %v730_v50 = vpack.c.bf16 %v118_v42, %v110_v41 }
  0x43   :  { %v137_v49 = vld [vmem:[#allocation5 + $0x258] sm:$0xff]  ;;  %v794_v51 = vpack.c.bf16 %v120_v45, %v112_v44  ;;  %v732_v52 = vpack.c.bf16 %v135_v47, %v127_v46  ;;  %v126_v53 = vld [vmem:[#allocation5 + $0x200] sm:$0xff]  ;;  %v128_v55 = vld [vmem:[#allocation5 + $0x210] sm:$0xff] }
  0x44   :  { %727 = vmatpush1.bf16.msra.mxu0 %v726_v34  ;;  %v134_v54 = vld [vmem:[#allocation5 + $0x240] sm:$0xff]  ;;  %v796_v56 = vpack.c.bf16 %v137_v49, %v129_v48  ;;  %v136_v57 = vld [vmem:[#allocation5 + $0x250] sm:$0xff]  ;;  %v143_v58 = vld [vmem:[#allocation5 + $0x288] sm:$0xff] }
  0x45   :  { %791 = vmatpush1.bf16.msra.mxu1 %v790_v38  ;;  %729 = vmatprep.subr.bf16.mxu0 %v728_v39  ;;  %v151_v59 = vld [vmem:[#allocation5 + $0x2c8] sm:$0xff]  ;;  %v145_v60 = vld [vmem:[#allocation5 + $0x298] sm:$0xff]  ;;  %v734_v62 = vpack.c.bf16 %v134_v54, %v126_v53  ;;  %v798_v63 = vpack.c.bf16 %v136_v57, %v128_v55  ;;  %v142_v1 = vld [vmem:[#allocation5 + $0x280] sm:$0xff] }
  0x46   :  { %793 = vmatprep.subr.bf16.mxu1 %v792_v43  ;;  %v153_v61 = vld [vmem:[#allocation5 + $0x2d8] sm:$0xff]  ;;  %v736_v0 = vpack.c.bf16 %v151_v59, %v143_v58  ;;  %v150_v2 = vld [vmem:[#allocation5 + $0x2c0] sm:$0xff]  ;;  %v144_v3 = vld [vmem:[#allocation5 + $0x290] sm:$0xff] }
  0x47   :  { %v800_v4 = vpack.c.bf16 %v153_v61, %v145_v60  ;;  %v152_v5 = vld [vmem:[#allocation5 + $0x2d0] sm:$0xff]  ;;  %v159_v6 = vld [vmem:[#allocation5 + $0x308] sm:$0xff]  ;;  %v161_v8 = vld [vmem:[#allocation5 + $0x318] sm:$0xff]  ;;  %v738_v10 = vpack.c.bf16 %v150_v2, %v142_v1 }
  0x48   :  { %731 = vmatpush1.bf16.msra.mxu0 %v730_v50  ;;  %v167_v7 = vld [vmem:[#allocation5 + $0x348] sm:$0xff]  ;;  %v169_v9 = vld [vmem:[#allocation5 + $0x358] sm:$0xff]  ;;  %v802_v11 = vpack.c.bf16 %v152_v5, %v144_v3  ;;  %v158_v13 = vld [vmem:[#allocation5 + $0x300] sm:$0xff] }
  0x49   :  { %795 = vmatpush1.bf16.msra.mxu1 %v794_v51  ;;  %733 = vmatprep.subr.bf16.mxu0 %v732_v52  ;;  %v740_v12 = vpack.c.bf16 %v167_v7, %v159_v6  ;;  %v166_v14 = vld [vmem:[#allocation5 + $0x340] sm:$0xff]  ;;  %v160_v15 = vld [vmem:[#allocation5 + $0x310] sm:$0xff]  ;;  %v804_v16 = vpack.c.bf16 %v169_v9, %v161_v8  ;;  %v175_v18 = vld [vmem:[#allocation5 + $0x388] sm:$0xff] }
  0x4a   :  { %797 = vmatprep.subr.bf16.mxu1 %v796_v56  ;;  %v168_v17 = vld [vmem:[#allocation5 + $0x350] sm:$0xff]  ;;  %v183_v19 = vld [vmem:[#allocation5 + $0x3c8] sm:$0xff]  ;;  %v177_v20 = vld [vmem:[#allocation5 + $0x398] sm:$0xff]  ;;  %v742_v22 = vpack.c.bf16 %v166_v14, %v158_v13 }
  0x4b   :  { %v185_v21 = vld [vmem:[#allocation5 + $0x3d8] sm:$0xff]  ;;  %v806_v23 = vpack.c.bf16 %v168_v17, %v160_v15  ;;  %v744_v24 = vpack.c.bf16 %v183_v19, %v175_v18  ;;  %v174_v25 = vld [vmem:[#allocation5 + $0x380] sm:$0xff]  ;;  %v176_v27 = vld [vmem:[#allocation5 + $0x390] sm:$0xff] }
  0x4c   :  { %735 = vmatpush1.bf16.msra.mxu0 %v734_v62  ;;  %v182_v26 = vld [vmem:[#allocation5 + $0x3c0] sm:$0xff]  ;;  %v808_v28 = vpack.c.bf16 %v185_v21, %v177_v20  ;;  %v184_v29 = vld [vmem:[#allocation5 + $0x3d0] sm:$0xff]  ;;  %v191_v30 = vld [vmem:[#allocation5 + $0x408] sm:$0xff] }
  0x4d   :  { %799 = vmatpush1.bf16.msra.mxu1 %v798_v63  ;;  %737 = vmatprep.subr.bf16.mxu0 %v736_v0  ;;  %v199_v31 = vld [vmem:[#allocation5 + $0x448] sm:$0xff]  ;;  %v193_v32 = vld [vmem:[#allocation5 + $0x418] sm:$0xff]  ;;  %v746_v34 = vpack.c.bf16 %v182_v26, %v174_v25  ;;  %v810_v35 = vpack.c.bf16 %v184_v29, %v176_v27  ;;  %v190_v37 = vld [vmem:[#allocation5 + $0x400] sm:$0xff] }
  0x4e   :  { %801 = vmatprep.subr.bf16.mxu1 %v800_v4  ;;  %v201_v33 = vld [vmem:[#allocation5 + $0x458] sm:$0xff]  ;;  %v748_v36 = vpack.c.bf16 %v199_v31, %v191_v30  ;;  %v198_v38 = vld [vmem:[#allocation5 + $0x440] sm:$0xff]  ;;  %v192_v39 = vld [vmem:[#allocation5 + $0x410] sm:$0xff] }
  0x4f   :  { %v812_v40 = vpack.c.bf16 %v201_v33, %v193_v32  ;;  %v200_v41 = vld [vmem:[#allocation5 + $0x450] sm:$0xff]  ;;  %v207_v42 = vld [vmem:[#allocation5 + $0x488] sm:$0xff]  ;;  %v209_v44 = vld [vmem:[#allocation5 + $0x498] sm:$0xff]  ;;  %v750_v46 = vpack.c.bf16 %v198_v38, %v190_v37 }
  0x50   :  { %739 = vmatpush1.bf16.msra.mxu0 %v738_v10  ;;  %v215_v43 = vld [vmem:[#allocation5 + $0x4c8] sm:$0xff]  ;;  %v217_v45 = vld [vmem:[#allocation5 + $0x4d8] sm:$0xff]  ;;  %v814_v47 = vpack.c.bf16 %v200_v41, %v192_v39  ;;  %v206_v49 = vld [vmem:[#allocation5 + $0x480] sm:$0xff] }
  0x51   :  { %803 = vmatpush1.bf16.msra.mxu1 %v802_v11  ;;  %741 = vmatprep.subr.bf16.mxu0 %v740_v12  ;;  %v752_v48 = vpack.c.bf16 %v215_v43, %v207_v42  ;;  %v214_v50 = vld [vmem:[#allocation5 + $0x4c0] sm:$0xff]  ;;  %v208_v51 = vld [vmem:[#allocation5 + $0x490] sm:$0xff]  ;;  %v816_v52 = vpack.c.bf16 %v217_v45, %v209_v44  ;;  %v223_v54 = vld [vmem:[#allocation5 + $0x508] sm:$0xff] }
  0x52   :  { %805 = vmatprep.subr.bf16.mxu1 %v804_v16  ;;  %v216_v53 = vld [vmem:[#allocation5 + $0x4d0] sm:$0xff]  ;;  %v231_v55 = vld [vmem:[#allocation5 + $0x548] sm:$0xff]  ;;  %v225_v56 = vld [vmem:[#allocation5 + $0x518] sm:$0xff]  ;;  %v754_v58 = vpack.c.bf16 %v214_v50, %v206_v49 }
  0x53   :  { %v233_v57 = vld [vmem:[#allocation5 + $0x558] sm:$0xff]  ;;  %v818_v59 = vpack.c.bf16 %v216_v53, %v208_v51  ;;  %v756_v60 = vpack.c.bf16 %v231_v55, %v223_v54  ;;  %v222_v61 = vld [vmem:[#allocation5 + $0x500] sm:$0xff]  ;;  %v224_v63 = vld [vmem:[#allocation5 + $0x510] sm:$0xff] }
  0x54   :  { %743 = vmatpush1.bf16.msra.mxu0 %v742_v22  ;;  %v230_v62 = vld [vmem:[#allocation5 + $0x540] sm:$0xff]  ;;  %v820_v0 = vpack.c.bf16 %v233_v57, %v225_v56  ;;  %v232_v1 = vld [vmem:[#allocation5 + $0x550] sm:$0xff]  ;;  %v239_v2 = vld [vmem:[#allocation5 + $0x588] sm:$0xff] }
  0x55   :  { %807 = vmatpush1.bf16.msra.mxu1 %v806_v23  ;;  %745 = vmatprep.subr.bf16.mxu0 %v744_v24  ;;  %v247_v3 = vld [vmem:[#allocation5 + $0x5c8] sm:$0xff]  ;;  %v241_v4 = vld [vmem:[#allocation5 + $0x598] sm:$0xff]  ;;  %v758_v6 = vpack.c.bf16 %v230_v62, %v222_v61  ;;  %v238_v7 = vld [vmem:[#allocation5 + $0x580] sm:$0xff]  ;;  %v822_v8 = vpack.c.bf16 %v232_v1, %v224_v63 }
  0x56   :  { %809 = vmatprep.subr.bf16.mxu1 %v808_v28  ;;  %v249_v5 = vld [vmem:[#allocation5 + $0x5d8] sm:$0xff]  ;;  %v760_v9 = vpack.c.bf16 %v247_v3, %v239_v2  ;;  %v246_v10 = vld [vmem:[#allocation5 + $0x5c0] sm:$0xff]  ;;  %v240_v11 = vld [vmem:[#allocation5 + $0x590] sm:$0xff] }
  0x57   :  { %v248_v12 = vld [vmem:[#allocation5 + $0x5d0] sm:$0xff]  ;;  %v824_v13 = vpack.c.bf16 %v249_v5, %v241_v4  ;;  %v255_v14 = vld [vmem:[#allocation5 + $0x608] sm:$0xff]  ;;  %v1144_v16 = vld [vmem:[#allocation2 + $0x8] sm:$0xff]  ;;  %v762_v19 = vpack.c.bf16 %v246_v10, %v238_v7 }
  0x58   :  { %747 = vmatpush1.bf16.msra.mxu0 %v746_v34  ;;  %v263_v15 = vld [vmem:[#allocation5 + $0x648] sm:$0xff]  ;;  %v257_v17 = vld [vmem:[#allocation5 + $0x618] sm:$0xff]  ;;  %406 = vmatprep.mubr.f32.mxu0 %v1144_v16  ;;  %v826_v20 = vpack.c.bf16 %v248_v12, %v240_v11  ;;  %v254_v22 = vld [vmem:[#allocation5 + $0x600] sm:$0xff] }
  0x59   :  { %811 = vmatpush1.bf16.msra.mxu1 %v810_v35  ;;  %749 = vmatprep.subr.bf16.mxu0 %v748_v36  ;;  %v265_v18 = vld [vmem:[#allocation5 + $0x658] sm:$0xff]  ;;  %v764_v21 = vpack.c.bf16 %v263_v15, %v255_v14  ;;  %v262_v23 = vld [vmem:[#allocation5 + $0x640] sm:$0xff]  ;;  %v256_v24 = vld [vmem:[#allocation5 + $0x610] sm:$0xff] }
  0x5a   :  { %813 = vmatprep.subr.bf16.mxu1 %v812_v40  ;;  %489 = vmatprep.mubr.f32.mxu1 %v1144_v16  ;;  %v828_v25 = vpack.c.bf16 %v265_v18, %v257_v17  ;;  %v264_v26 = vld [vmem:[#allocation5 + $0x650] sm:$0xff]  ;;  %v271_v27 = vld [vmem:[#allocation5 + $0x688] sm:$0xff]  ;;  %v273_v29 = vld [vmem:[#allocation5 + $0x698] sm:$0xff]  ;;  %v766_v31 = vpack.c.bf16 %v262_v23, %v254_v22 }
  0x5b   :  { %v279_v28 = vld [vmem:[#allocation5 + $0x6c8] sm:$0xff]  ;;  %v281_v30 = vld [vmem:[#allocation5 + $0x6d8] sm:$0xff]  ;;  %v830_v32 = vpack.c.bf16 %v264_v26, %v256_v24  ;;  %v270_v34 = vld [vmem:[#allocation5 + $0x680] sm:$0xff] }
  0x5c   :  { %751 = vmatpush1.bf16.msra.mxu0 %v750_v46  ;;  %v768_v33 = vpack.c.bf16 %v279_v28, %v271_v27  ;;  %v278_v35 = vld [vmem:[#allocation5 + $0x6c0] sm:$0xff]  ;;  %v272_v36 = vld [vmem:[#allocation5 + $0x690] sm:$0xff]  ;;  %v832_v37 = vpack.c.bf16 %v281_v30, %v273_v29  ;;  %v287_v39 = vld [vmem:[#allocation5 + $0x708] sm:$0xff] }
  0x5d   :  { %815 = vmatpush1.bf16.msra.mxu1 %v814_v47  ;;  %753 = vmatprep.subr.bf16.mxu0 %v752_v48  ;;  %v280_v38 = vld [vmem:[#allocation5 + $0x6d0] sm:$0xff]  ;;  %v295_v40 = vld [vmem:[#allocation5 + $0x748] sm:$0xff]  ;;  %v289_v41 = vld [vmem:[#allocation5 + $0x718] sm:$0xff]  ;;  %v770_v43 = vpack.c.bf16 %v278_v35, %v270_v34 }
  0x5e   :  { %817 = vmatprep.subr.bf16.mxu1 %v816_v52  ;;  %v297_v42 = vld [vmem:[#allocation5 + $0x758] sm:$0xff]  ;;  %v834_v44 = vpack.c.bf16 %v280_v38, %v272_v36  ;;  %v772_v45 = vpack.c.bf16 %v295_v40, %v287_v39  ;;  %v286_v46 = vld [vmem:[#allocation5 + $0x700] sm:$0xff]  ;;  %v288_v48 = vld [vmem:[#allocation5 + $0x710] sm:$0xff] }
  0x5f   :  { %v294_v47 = vld [vmem:[#allocation5 + $0x740] sm:$0xff]  ;;  %v836_v49 = vpack.c.bf16 %v297_v42, %v289_v41  ;;  %v296_v50 = vld [vmem:[#allocation5 + $0x750] sm:$0xff]  ;;  %v303_v51 = vld [vmem:[#allocation5 + $0x788] sm:$0xff] }
  0x60   :  { %755 = vmatpush1.bf16.msra.mxu0 %v754_v58  ;;  %v311_v52 = vld [vmem:[#allocation5 + $0x7c8] sm:$0xff]  ;;  %v305_v53 = vld [vmem:[#allocation5 + $0x798] sm:$0xff]  ;;  %v774_v55 = vpack.c.bf16 %v294_v47, %v286_v46  ;;  %v838_v56 = vpack.c.bf16 %v296_v50, %v288_v48  ;;  %v302_v58 = vld [vmem:[#allocation5 + $0x780] sm:$0xff] }
  0x61   :  { %819 = vmatpush1.bf16.msra.mxu1 %v818_v59  ;;  %757 = vmatprep.subr.bf16.mxu0 %v756_v60  ;;  %v313_v54 = vld [vmem:[#allocation5 + $0x7d8] sm:$0xff]  ;;  %v776_v57 = vpack.c.bf16 %v311_v52, %v303_v51  ;;  %v310_v59 = vld [vmem:[#allocation5 + $0x7c0] sm:$0xff]  ;;  %v304_v60 = vld [vmem:[#allocation5 + $0x790] sm:$0xff] }
  0x62   :  { %821 = vmatprep.subr.bf16.mxu1 %v820_v0  ;;  %v840_v61 = vpack.c.bf16 %v313_v54, %v305_v53  ;;  %v312_v62 = vld [vmem:[#allocation5 + $0x7d0] sm:$0xff]  ;;  %v67_v63 = vld [vmem:[#allocation5 + $0x28] sm:$0xff]  ;;  %v69_v1 = vld [vmem:[#allocation5 + $0x38] sm:$0xff]  ;;  %v778_v3 = vpack.c.bf16 %v310_v59, %v302_v58 }
  0x63   :  { %v75_v0 = vld [vmem:[#allocation5 + $0x68] sm:$0xff]  ;;  %v77_v2 = vld [vmem:[#allocation5 + $0x78] sm:$0xff]  ;;  %v842_v4 = vpack.c.bf16 %v312_v62, %v304_v60  ;;  %v74_v7 = vld [vmem:[#allocation5 + $0x60] sm:$0xff] }
  0x64   :  { %759 = vmatpush1.bf16.msra.mxu0 %v758_v6  ;;  %v844_v5 = vpack.c.bf16 %v75_v0, %v67_v63  ;;  %v66_v6 = vld [vmem:[#allocation5 + $0x20] sm:$0xff]  ;;  %v76_v10 = vld [vmem:[#allocation5 + $0x70] sm:$0xff]  ;;  %v83_v11 = vld [vmem:[#allocation5 + $0xa8] sm:$0xff] }
  0x65   :  { %823 = vmatpush1.bf16.msra.mxu1 %v822_v8  ;;  %761 = vmatprep.subr.bf16.mxu0 %v760_v9  ;;  %v68_v8 = vld [vmem:[#allocation5 + $0x30] sm:$0xff]  ;;  %v908_v9 = vpack.c.bf16 %v77_v2, %v69_v1  ;;  %v91_v12 = vld [vmem:[#allocation5 + $0xe8] sm:$0xff]  ;;  %v93_v14 = vld [vmem:[#allocation5 + $0xf8] sm:$0xff]  ;;  %v846_v17 = vpack.c.bf16 %v74_v7, %v66_v6 }
  0x66   :  { %825 = vmatprep.subr.bf16.mxu1 %v824_v13  ;;  %v85_v13 = vld [vmem:[#allocation5 + $0xb8] sm:$0xff]  ;;  %v1148_v15 = vld [vmem:[#allocation2] sm:$0xff]  ;;  %v910_v18 = vpack.c.bf16 %v76_v10, %v68_v8  ;;  %v107_v26 = vld [vmem:[#allocation5 + $0x168] sm:$0xff] }
  0x67   :  { %v84_v22 = vld [vmem:[#allocation5 + $0xb0] sm:$0xff]  ;;  %v912_v23 = vpack.c.bf16 %v93_v14, %v85_v13  ;;  %v101_v27 = vld [vmem:[#allocation5 + $0x138] sm:$0xff]  ;;  %v123_v38 = vld [vmem:[#allocation5 + $0x1e8] sm:$0xff] }
  0x68   :  { %763 = vmatpush1.bf16.msra.mxu0 %v762_v19  ;;  %v848_v19 = vpack.c.bf16 %v91_v12, %v83_v11  ;;  %v92_v24 = vld [vmem:[#allocation5 + $0xf0] sm:$0xff]  ;;  %v109_v28 = vld [vmem:[#allocation5 + $0x178] sm:$0xff]  ;;  %v139_v50 = vld [vmem:[#allocation5 + $0x268] sm:$0xff] }
  0x69   :  { %827 = vmatpush1.bf16.msra.mxu1 %v826_v20  ;;  %765 = vmatprep.subr.bf16.mxu0 %v764_v21  ;;  %v82_v20 = vld [vmem:[#allocation5 + $0xa0] sm:$0xff]  ;;  %v914_v30 = vpack.c.bf16 %v92_v24, %v84_v22  ;;  %v100_v34 = vld [vmem:[#allocation5 + $0x130] sm:$0xff]  ;;  %v916_v35 = vpack.c.bf16 %v109_v28, %v101_v27  ;;  %v117_v39 = vld [vmem:[#allocation5 + $0x1b8] sm:$0xff] }
  0x6a   :  { %829 = vmatprep.subr.bf16.mxu1 %v828_v25  ;;  %v90_v21 = vld [vmem:[#allocation5 + $0xe0] sm:$0xff]  ;;  %v99_v25 = vld [vmem:[#allocation5 + $0x128] sm:$0xff]  ;;  %v108_v36 = vld [vmem:[#allocation5 + $0x170] sm:$0xff] }
  0x6b   :  { %v850_v29 = vpack.c.bf16 %v90_v21, %v82_v20  ;;  %v125_v40 = vld [vmem:[#allocation5 + $0x1f8] sm:$0xff]  ;;  %v918_v42 = vpack.c.bf16 %v108_v36, %v100_v34  ;;  %v116_v46 = vld [vmem:[#allocation5 + $0x1b0] sm:$0xff]  ;;  %v155_v62 = vld [vmem:[#allocation5 + $0x2e8] sm:$0xff] }
  0x6c   :  { %767 = vmatpush1.bf16.msra.mxu0 %v766_v31  ;;  %v852_v31 = vpack.c.bf16 %v107_v26, %v99_v25  ;;  %v920_v47 = vpack.c.bf16 %v125_v40, %v117_v39  ;;  %v124_v48 = vld [vmem:[#allocation5 + $0x1f0] sm:$0xff]  ;;  %v133_v51 = vld [vmem:[#allocation5 + $0x238] sm:$0xff]  ;;  %v146_v2 = vld [vmem:[#allocation5 + $0x2a0] sm:$0xff] }
  0x6d   :  { %831 = vmatpush1.bf16.msra.mxu1 %v830_v32  ;;  %769 = vmatprep.subr.bf16.mxu0 %v768_v33  ;;  %v98_v32 = vld [vmem:[#allocation5 + $0x120] sm:$0xff]  ;;  %v141_v52 = vld [vmem:[#allocation5 + $0x278] sm:$0xff]  ;;  %v922_v54 = vpack.c.bf16 %v124_v48, %v116_v46  ;;  %v132_v58 = vld [vmem:[#allocation5 + $0x230] sm:$0xff] }
  0x6e   :  { %833 = vmatprep.subr.bf16.mxu1 %v832_v37  ;;  %v106_v33 = vld [vmem:[#allocation5 + $0x160] sm:$0xff]  ;;  %v115_v37 = vld [vmem:[#allocation5 + $0x1a8] sm:$0xff]  ;;  %v924_v59 = vpack.c.bf16 %v141_v52, %v133_v51  ;;  %v140_v60 = vld [vmem:[#allocation5 + $0x270] sm:$0xff] }
  0x6f   :  { %v854_v41 = vpack.c.bf16 %v106_v33, %v98_v32  ;;  %v149_v63 = vld [vmem:[#allocation5 + $0x2b8] sm:$0xff]  ;;  %v154_v6 = vld [vmem:[#allocation5 + $0x2e0] sm:$0xff]  ;;  %v148_v7 = vld [vmem:[#allocation5 + $0x2b0] sm:$0xff] }
  0x70   :  { %771 = vmatpush1.bf16.msra.mxu0 %v770_v43  ;;  %v856_v43 = vpack.c.bf16 %v123_v38, %v115_v37  ;;  %v157_v0 = vld [vmem:[#allocation5 + $0x2f8] sm:$0xff]  ;;  %v1154_v8 = vld [vmem:[#allocation2 + $0x10] sm:$0xff]  ;;  %v156_v10 = vld [vmem:[#allocation5 + $0x2f0] sm:$0xff] }
  0x71   :  { %835 = vmatpush1.bf16.msra.mxu1 %v834_v44  ;;  %773 = vmatprep.subr.bf16.mxu0 %v772_v45  ;;  %v114_v44 = vld [vmem:[#allocation5 + $0x1a0] sm:$0xff]  ;;  %v163_v11 = vld [vmem:[#allocation5 + $0x328] sm:$0xff]  ;;  %v165_v13 = vld [vmem:[#allocation5 + $0x338] sm:$0xff]  ;;  %v930_v20 = vpack.c.bf16 %v156_v10, %v148_v7 }
  0x72   :  { %837 = vmatprep.subr.bf16.mxu1 %v836_v49  ;;  %v122_v45 = vld [vmem:[#allocation5 + $0x1e0] sm:$0xff]  ;;  %v131_v49 = vld [vmem:[#allocation5 + $0x228] sm:$0xff]  ;;  %v173_v14 = vld [vmem:[#allocation5 + $0x378] sm:$0xff] }
  0x73   :  { %v858_v53 = vpack.c.bf16 %v122_v45, %v114_v44  ;;  %v171_v12 = vld [vmem:[#allocation5 + $0x368] sm:$0xff]  ;;  %v162_v22 = vld [vmem:[#allocation5 + $0x320] sm:$0xff]  ;;  %v164_v24 = vld [vmem:[#allocation5 + $0x330] sm:$0xff]  ;;  %v932_v25 = vpack.c.bf16 %v173_v14, %v165_v13 }
  0x74   :  { %775 = vmatpush1.bf16.msra.mxu0 %v774_v55  ;;  %v860_v55 = vpack.c.bf16 %v139_v50, %v131_v49  ;;  %v868_v21 = vpack.c.bf16 %v171_v12, %v163_v11  ;;  %v172_v26 = vld [vmem:[#allocation5 + $0x370] sm:$0xff]  ;;  %v179_v27 = vld [vmem:[#allocation5 + $0x3a8] sm:$0xff]  ;;  %v178_v34 = vld [vmem:[#allocation5 + $0x3a0] sm:$0xff] }
  0x75   :  { %839 = vmatpush1.bf16.msra.mxu1 %v838_v56  ;;  %777 = vmatprep.subr.bf16.mxu0 %v776_v57  ;;  %v130_v56 = vld [vmem:[#allocation5 + $0x220] sm:$0xff]  ;;  %v187_v28 = vld [vmem:[#allocation5 + $0x3e8] sm:$0xff]  ;;  %v934_v32 = vpack.c.bf16 %v172_v26, %v164_v24  ;;  %v180_v36 = vld [vmem:[#allocation5 + $0x3b0] sm:$0xff] }
  0x76   :  { %841 = vmatprep.subr.bf16.mxu1 %v840_v61  ;;  %v138_v57 = vld [vmem:[#allocation5 + $0x260] sm:$0xff]  ;;  %v147_v61 = vld [vmem:[#allocation5 + $0x2a8] sm:$0xff]  ;;  %v872_v33 = vpack.c.bf16 %v187_v28, %v179_v27  ;;  %v188_v38 = vld [vmem:[#allocation5 + $0x3f0] sm:$0xff] }
  0x77   :  { %v862_v1 = vpack.c.bf16 %v138_v57, %v130_v56  ;;  %v195_v39 = vld [vmem:[#allocation5 + $0x428] sm:$0xff]  ;;  %v938_v44 = vpack.c.bf16 %v188_v38, %v180_v36  ;;  %v194_v46 = vld [vmem:[#allocation5 + $0x420] sm:$0xff]  ;;  %v196_v48 = vld [vmem:[#allocation5 + $0x430] sm:$0xff] }
  0x78   :  { %779 = vmatpush1.bf16.msra.mxu0 %v778_v3  ;;  %v1152_v3 = vld [vmem:[#allocation2 + $0x18] sm:$0xff]  ;;  %v204_v50 = vld [vmem:[#allocation5 + $0x470] sm:$0xff]  ;;  %v210_v57 = vld [vmem:[#allocation5 + $0x4a0] sm:$0xff] }
  0x79   :  { %843 = vmatpush1.bf16.msra.mxu1 %v842_v4  ;;  %845 = vmatprep.subr.bf16.mxu0 %v844_v5  ;;  %v926_v4 = vpack.c.bf16 %v140_v60, %v132_v58  ;;  %v864_v5 = vpack.c.bf16 %v155_v62, %v147_v61  ;;  %v203_v40 = vld [vmem:[#allocation5 + $0x468] sm:$0xff]  ;;  %v218_v58 = vld [vmem:[#allocation5 + $0x4e0] sm:$0xff]  ;;  %v220_v61 = vld [vmem:[#allocation5 + $0x4f0] sm:$0xff] }
  0x7a   :  { %909 = vmatprep.subr.bf16.mxu1 %v908_v9  ;;  %v928_v9 = vpack.c.bf16 %v157_v0, %v149_v63  ;;  %v876_v45 = vpack.c.bf16 %v203_v40, %v195_v39  ;;  %v211_v51 = vld [vmem:[#allocation5 + $0x4a8] sm:$0xff]  ;;  %v229_v0 = vld [vmem:[#allocation5 + $0x538] sm:$0xff]  ;;  %v234_v7 = vld [vmem:[#allocation5 + $0x560] sm:$0xff] }
  0x7b   :  { %407 = vmatmul.mubr.f32.vlgmr.msra.gmra.mrb[0].mxu0 %v1148_v15  ;;  %v219_v52 = vld [vmem:[#allocation5 + $0x4e8] sm:$0xff]  ;;  %v236_v11 = vld [vmem:[#allocation5 + $0x570] sm:$0xff]  ;;  %v245_v14 = vld [vmem:[#allocation5 + $0x5b8] sm:$0xff] }
  0x7c   :  { %490 = vmatmul.mubr.f32.vlgmr.msra.gmra.mrb[0].mxu1 %v1148_v15  ;;  %847 = vmatpush1.bf16.msra.mxu0 %v846_v17  ;;  %v866_v17 = vpack.c.bf16 %v154_v6, %v146_v2  ;;  %v880_v56 = vpack.c.bf16 %v219_v52, %v211_v51  ;;  %v227_v62 = vld [vmem:[#allocation5 + $0x528] sm:$0xff]  ;;  %v882_v2 = vpack.c.bf16 %v218_v58, %v210_v57  ;;  %v226_v6 = vld [vmem:[#allocation5 + $0x520] sm:$0xff]  ;;  %v252_v27 = vld [vmem:[#allocation5 + $0x5f0] sm:$0xff] }
  0x7d   :  { %911 = vmatpush1.bf16.msra.mxu1 %v910_v18  ;;  %849 = vmatprep.subr.bf16.mxu0 %v848_v19  ;;  %v1160_v18 = vld [vmem:[#allocation2 + $0x28] sm:$0xff]  ;;  %v1162_v19 = vld [vmem:[#allocation2 + $0x20] sm:$0xff]  ;;  %v235_v63 = vld [vmem:[#allocation5 + $0x568] sm:$0xff] }
  0x7e   :  { %913 = vmatprep.subr.bf16.mxu1 %v912_v23  ;;  %412 = vmatprep.mubr.f32.mxu0 %v1152_v3  ;;  %v170_v23 = vld [vmem:[#allocation5 + $0x360] sm:$0xff]  ;;  %v243_v12 = vld [vmem:[#allocation5 + $0x5a8] sm:$0xff]  ;;  %v268_v39 = vld [vmem:[#allocation5 + $0x670] sm:$0xff] }
  0x7f   :  { %495 = vmatprep.mubr.f32.mxu1 %v1152_v3  ;;  %413 = vmatmul.mubr.f32.gmra.mrb[2].mxu0 %v1154_v8  ;;  %v251_v13 = vld [vmem:[#allocation5 + $0x5e8] sm:$0xff]  ;;  %v250_v24 = vld [vmem:[#allocation5 + $0x5e0] sm:$0xff]  ;;  %v284_v51 = vld [vmem:[#allocation5 + $0x6f0] sm:$0xff] }
  0x80   :  { %851 = vmatpush1.bf16.msra.mxu0 %v850_v29  ;;  %496 = vmatmul.mubr.f32.gmra.mrb[2].mxu1 %v1154_v8  ;;  %v181_v29 = vld [vmem:[#allocation5 + $0x3b8] sm:$0xff]  ;;  %v259_v28 = vld [vmem:[#allocation5 + $0x628] sm:$0xff]  ;;  %v266_v36 = vld [vmem:[#allocation5 + $0x660] sm:$0xff] }
  0x81   :  { %915 = vmatpush1.bf16.msra.mxu1 %v914_v30  ;;  %853 = vmatprep.subr.bf16.mxu0 %v852_v31  ;;  %v189_v30 = vld [vmem:[#allocation5 + $0x3f8] sm:$0xff]  ;;  %v870_v31 = vpack.c.bf16 %v170_v23, %v162_v22  ;;  %v888_v22 = vpack.c.bf16 %v251_v13, %v243_v12  ;;  %v242_v23 = vld [vmem:[#allocation5 + $0x5a0] sm:$0xff]  ;;  %v275_v40 = vld [vmem:[#allocation5 + $0x6a8] sm:$0xff] }
  0x82   :  { %917 = vmatprep.subr.bf16.mxu1 %v916_v35  ;;  %418 = vmatprep.mubr.f32.mxu0 %v1160_v18  ;;  %v186_v35 = vld [vmem:[#allocation5 + $0x3e0] sm:$0xff]  ;;  %v936_v37 = vpack.c.bf16 %v189_v30, %v181_v29  ;;  %v267_v29 = vld [vmem:[#allocation5 + $0x668] sm:$0xff]  ;;  %v261_v30 = vld [vmem:[#allocation5 + $0x638] sm:$0xff] }
  0x83   :  { %501 = vmatprep.mubr.f32.mxu1 %v1160_v18  ;;  %419 = vmatmul.mubr.f32.gmra.mrb[4].mxu0 %v1162_v19  ;;  %v291_v52 = vld [vmem:[#allocation5 + $0x728] sm:$0xff]  ;;  %v290_v58 = vld [vmem:[#allocation5 + $0x720] sm:$0xff]  ;;  %v316_v12 = vld [vmem:[#allocation5 + $0x7f0] sm:$0xff] }
  0x84   :  { %855 = vmatpush1.bf16.msra.mxu0 %v854_v41  ;;  %502 = vmatmul.mubr.f32.gmra.mrb[4].mxu1 %v1162_v19  ;;  %v197_v41 = vld [vmem:[#allocation5 + $0x438] sm:$0xff] }
  0x85   :  { %919 = vmatpush1.bf16.msra.mxu1 %v918_v42  ;;  %857 = vmatprep.subr.bf16.mxu0 %v856_v43  ;;  %v205_v42 = vld [vmem:[#allocation5 + $0x478] sm:$0xff]  ;;  %v874_v43 = vpack.c.bf16 %v186_v35, %v178_v34  ;;  %v892_v34 = vpack.c.bf16 %v267_v29, %v259_v28  ;;  %v258_v35 = vld [vmem:[#allocation5 + $0x620] sm:$0xff]  ;;  %v328_v28 = vld [vmem:[#allocation7 + $0x50] sm:$0xff] }
  0x86   :  { %921 = vmatprep.subr.bf16.mxu1 %v920_v47  ;;  %572 = vmatprep.mubr.f32.mxu0 %v1144_v16  ;;  %v202_v47 = vld [vmem:[#allocation5 + $0x460] sm:$0xff]  ;;  %v940_v49 = vpack.c.bf16 %v205_v42, %v197_v41  ;;  %v283_v41 = vld [vmem:[#allocation5 + $0x6e8] sm:$0xff]  ;;  %v277_v42 = vld [vmem:[#allocation5 + $0x6b8] sm:$0xff] }
  0x87   :  { %655 = vmatprep.mubr.f32.mxu1 %v1144_v16  ;;  %v942_v16 = vpack.c.bf16 %v204_v50, %v196_v48  ;;  %v282_v48 = vld [vmem:[#allocation5 + $0x6e0] sm:$0xff]  ;;  %v327_v29 = vld [vmem:[#allocation7 + $0x48] sm:$0xff] }
  0x88   :  { %859 = vmatpush1.bf16.msra.mxu0 %v858_v53  ;;  %v213_v53 = vld [vmem:[#allocation5 + $0x4b8] sm:$0xff] }
  0x89   :  { %923 = vmatpush1.bf16.msra.mxu1 %v922_v54  ;;  %861 = vmatprep.subr.bf16.mxu0 %v860_v55  ;;  %v221_v54 = vld [vmem:[#allocation5 + $0x4f8] sm:$0xff]  ;;  %v878_v55 = vpack.c.bf16 %v202_v47, %v194_v46  ;;  %v896_v46 = vpack.c.bf16 %v283_v41, %v275_v40  ;;  %v274_v47 = vld [vmem:[#allocation5 + $0x6a0] sm:$0xff]  ;;  %v335_v40 = vld [vmem:[#allocation7 + $0x88] sm:$0xff] }
  0x8a   :  { %925 = vmatprep.subr.bf16.mxu1 %v924_v59  ;;  %v212_v59 = vld [vmem:[#allocation5 + $0x4b0] sm:$0xff]  ;;  %v944_v60 = vpack.c.bf16 %v221_v54, %v213_v53  ;;  %v299_v53 = vld [vmem:[#allocation5 + $0x768] sm:$0xff]  ;;  %v293_v54 = vld [vmem:[#allocation5 + $0x738] sm:$0xff] }
  0x8b   :  { %v900_v57 = vpack.c.bf16 %v299_v53, %v291_v52  ;;  %v323_v52 = vld [vmem:[#allocation7 + $0x28] sm:$0xff] }
  0x8c   :  { %863 = vmatpush1.bf16.msra.mxu0 %v862_v1  ;;  %v237_v1 = vld [vmem:[#allocation5 + $0x578] sm:$0xff] }
  0x8d   :  { %927 = vmatpush1.bf16.msra.mxu1 %v926_v4  ;;  %865 = vmatprep.subr.bf16.mxu0 %v864_v5  ;;  %v946_v4 = vpack.c.bf16 %v220_v61, %v212_v59  ;;  %v884_v5 = vpack.c.bf16 %v235_v63, %v227_v62  ;;  %v948_v10 = vpack.c.bf16 %v237_v1, %v229_v0  ;;  %v298_v59 = vld [vmem:[#allocation5 + $0x760] sm:$0xff]  ;;  %v300_v62 = vld [vmem:[#allocation5 + $0x770] sm:$0xff]  ;;  %v307_v63 = vld [vmem:[#allocation5 + $0x7a8] sm:$0xff] }
  0x8e   :  { %929 = vmatprep.subr.bf16.mxu1 %v928_v9  ;;  %v228_v9 = vld [vmem:[#allocation5 + $0x530] sm:$0xff]  ;;  %v315_v0 = vld [vmem:[#allocation5 + $0x7e8] sm:$0xff]  ;;  %v309_v1 = vld [vmem:[#allocation5 + $0x7b8] sm:$0xff] }
  0x90   :  { %867 = vmatpush1.bf16.msra.mxu0 %v866_v17  ;;  %v253_v17 = vld [vmem:[#allocation5 + $0x5f8] sm:$0xff] }
  0x91   :  { %931 = vmatpush1.bf16.msra.mxu1 %v930_v20  ;;  %869 = vmatprep.subr.bf16.mxu0 %v868_v21  ;;  %v886_v20 = vpack.c.bf16 %v234_v7, %v226_v6  ;;  %v950_v21 = vpack.c.bf16 %v236_v11, %v228_v9  ;;  %v952_v26 = vpack.c.bf16 %v253_v17, %v245_v14  ;;  %v306_v7 = vld [vmem:[#allocation5 + $0x7a0] sm:$0xff]  ;;  %v308_v11 = vld [vmem:[#allocation5 + $0x7b0] sm:$0xff] }
  0x92   :  { %933 = vmatprep.subr.bf16.mxu1 %v932_v25  ;;  %v244_v25 = vld [vmem:[#allocation5 + $0x5b0] sm:$0xff]  ;;  %v904_v6 = vpack.c.bf16 %v315_v0, %v307_v63  ;;  %v314_v9 = vld [vmem:[#allocation5 + $0x7e0] sm:$0xff]  ;;  %v970_v14 = vpack.c.bf16 %v316_v12, %v308_v11  ;;  %v331_v63 = vld [vmem:[#allocation7 + $0x68] sm:$0xff] }
  0x93   :  { %v906_v13 = vpack.c.bf16 %v314_v9, %v306_v7  ;;  %v318_v17 = vld [vmem:[#allocation7] sm:$0xff]  ;;  %v340_v12 = vld [vmem:[#allocation7 + $0xb0] sm:$0xff] }
  0x94   :  { %871 = vmatpush1.bf16.msra.mxu0 %v870_v31  ;;  %v269_v31 = vld [vmem:[#allocation5 + $0x678] sm:$0xff] }
  0x95   :  { %935 = vmatpush1.bf16.msra.mxu1 %v934_v32  ;;  %873 = vmatprep.subr.bf16.mxu0 %v872_v33  ;;  %v890_v32 = vpack.c.bf16 %v250_v24, %v242_v23  ;;  %v954_v33 = vpack.c.bf16 %v252_v27, %v244_v25  ;;  %v956_v38 = vpack.c.bf16 %v269_v31, %v261_v30  ;;  %v329_v30 = vld [vmem:[#allocation7 + $0x58] sm:$0xff] }
  0x96   :  { %937 = vmatprep.subr.bf16.mxu1 %v936_v37  ;;  %v260_v37 = vld [vmem:[#allocation5 + $0x630] sm:$0xff] }
  0x98   :  { %875 = vmatpush1.bf16.msra.mxu0 %v874_v43  ;;  %v285_v43 = vld [vmem:[#allocation5 + $0x6f8] sm:$0xff] }
  0x99   :  { %939 = vmatpush1.bf16.msra.mxu1 %v938_v44  ;;  %877 = vmatprep.subr.bf16.mxu0 %v876_v45  ;;  %v894_v44 = vpack.c.bf16 %v266_v36, %v258_v35  ;;  %v958_v45 = vpack.c.bf16 %v268_v39, %v260_v37  ;;  %v960_v50 = vpack.c.bf16 %v285_v43, %v277_v42  ;;  %v334_v37 = vld [vmem:[#allocation7 + $0x80] sm:$0xff]  ;;  %v336_v39 = vld [vmem:[#allocation7 + $0x90] sm:$0xff]  ;;  %v337_v42 = vld [vmem:[#allocation7 + $0x98] sm:$0xff] }
  0x9a   :  { %941 = vmatprep.subr.bf16.mxu1 %v940_v49  ;;  %v276_v49 = vld [vmem:[#allocation5 + $0x6b0] sm:$0xff] }
  0x9c   :  { %879 = vmatpush1.bf16.msra.mxu0 %v878_v55  ;;  %v301_v55 = vld [vmem:[#allocation5 + $0x778] sm:$0xff] }
  0x9d   :  { %943 = vmatpush1.bf16.msra.mxu1 %v942_v16  ;;  %881 = vmatprep.subr.bf16.mxu0 %v880_v56  ;;  %v898_v16 = vpack.c.bf16 %v282_v48, %v274_v47  ;;  %v962_v56 = vpack.c.bf16 %v284_v51, %v276_v49  ;;  %v964_v61 = vpack.c.bf16 %v301_v55, %v293_v54  ;;  %v324_v51 = vld [vmem:[#allocation7 + $0x30] sm:$0xff]  ;;  %v325_v54 = vld [vmem:[#allocation7 + $0x38] sm:$0xff] }
  0x9e   :  { %945 = vmatprep.subr.bf16.mxu1 %v944_v60  ;;  %v292_v60 = vld [vmem:[#allocation5 + $0x730] sm:$0xff] }
  0xa0   :  { %883 = vmatpush1.bf16.msra.mxu0 %v882_v2  ;;  %v317_v2 = vld [vmem:[#allocation5 + $0x7f8] sm:$0xff] }
  0xa1   :  { %947 = vmatpush1.bf16.msra.mxu1 %v946_v4  ;;  %885 = vmatprep.subr.bf16.mxu0 %v884_v5  ;;  %v902_v4 = vpack.c.bf16 %v298_v59, %v290_v58  ;;  %v966_v5 = vpack.c.bf16 %v300_v62, %v292_v60  ;;  %v330_v60 = vld [vmem:[#allocation7 + $0x60] sm:$0xff]  ;;  %v332_v62 = vld [vmem:[#allocation7 + $0x70] sm:$0xff] }
  0xa2   :  { %949 = vmatprep.subr.bf16.mxu1 %v948_v10  ;;  %v968_v10 = vpack.c.bf16 %v317_v2, %v309_v1  ;;  %v333_v1 = vld [vmem:[#allocation7 + $0x78] sm:$0xff] }
  0xa4   :  { %887 = vmatpush1.bf16.msra.mxu0 %v886_v20  ;;  %v320_v20 = vld [vmem:[#allocation7 + $0x10] sm:$0xff] }
  0xa5   :  { %951 = vmatpush1.bf16.msra.mxu1 %v950_v21  ;;  %889 = vmatprep.subr.bf16.mxu0 %v888_v22  ;;  %v319_v21 = vld [vmem:[#allocation7 + $0x8] sm:$0xff]  ;;  %v321_v22 = vld [vmem:[#allocation7 + $0x18] sm:$0xff] }
  0xa6   :  { %953 = vmatprep.subr.bf16.mxu1 %v952_v26 }
  0xa8   :  { %891 = vmatpush1.bf16.msra.mxu0 %v890_v32 }
  0xa9   :  { %955 = vmatpush1.bf16.msra.mxu1 %v954_v33  ;;  %893 = vmatprep.subr.bf16.mxu0 %v892_v34 }
  0xaa   :  { %957 = vmatprep.subr.bf16.mxu1 %v956_v38 }
  0xac   :  { %895 = vmatpush1.bf16.msra.mxu0 %v894_v44 }
  0xad   :  { %959 = vmatpush1.bf16.msra.mxu1 %v958_v45  ;;  %897 = vmatprep.subr.bf16.mxu0 %v896_v46 }
  0xae   :  { %961 = vmatprep.subr.bf16.mxu1 %v960_v50  ;;  %v322_v50 = vld [vmem:[#allocation7 + $0x20] sm:$0xff] }
  0xb0   :  { %899 = vmatpush1.bf16.msra.mxu0 %v898_v16 }
  0xb1   :  { %963 = vmatpush1.bf16.msra.mxu1 %v962_v56  ;;  %901 = vmatprep.subr.bf16.mxu0 %v900_v57 }
  0xb2   :  { %965 = vmatprep.subr.bf16.mxu1 %v964_v61 }
  0xb4   :  { %903 = vmatpush1.bf16.msra.mxu0 %v902_v4 }
  0xb5   :  { %967 = vmatpush1.bf16.msra.mxu1 %v966_v5  ;;  %905 = vmatprep.subr.bf16.mxu0 %v904_v6 }
  0xb6   :  { %969 = vmatprep.subr.bf16.mxu1 %v968_v10  ;;  %v338_v10 = vld [vmem:[#allocation7 + $0xa0] sm:$0xff] }
  0xb8   :  { %907 = vmatpush1.bf16.msra.mxu0 %v906_v13  ;;  %v339_v13 = vld [vmem:[#allocation7 + $0xa8] sm:$0xff] }
  0xb9   :  { %971 = vmatpush1.bf16.msra.mxu1 %v970_v14 }
  0xbb   :  { %573 = vmatmul.mubr.f32.vlgmr.msra.gmra.mrb[6].mxu0 %v1148_v15 }
  0xbc   :  { %656 = vmatmul.mubr.f32.vlgmr.msra.gmra.mrb[6].mxu1 %v1148_v15  ;;  %578 = vmatprep.mubr.f32.mxu0 %v1152_v3 }
  0xbd   :  { %661 = vmatprep.mubr.f32.mxu1 %v1152_v3 }
  0xbf   :  { %579 = vmatmul.mubr.f32.gmra.mrb[8].mxu0 %v1154_v8 }
  0xc0   :  { %662 = vmatmul.mubr.f32.gmra.mrb[8].mxu1 %v1154_v8  ;;  %584 = vmatprep.mubr.f32.mxu0 %v1160_v18 }
  0xc1   :  { %667 = vmatprep.mubr.f32.mxu1 %v1160_v18  ;;  %v326_v18 = vld [vmem:[#allocation7 + $0x40] sm:$0xff] }
  0xc3   :  { %585 = vmatmul.mubr.f32.gmra.mrb[10].mxu0 %v1162_v19 }
  0xc4   :  { %668 = vmatmul.mubr.f32.gmra.mrb[10].mxu1 %v1162_v19 }
 0x14e   :  { %v408_v15 = vpop.f32.mrb[0].mxu0 }
 0x14f   :  { %v409_v23 = vadd.f32 %v408_v15, %v318_v17  ;;  %v491_v24 = vpop.f32.mrb[0].mxu1  ;;  %v410_v3 = vpop.f32.mrb[1].mxu0  ;;  %v341_v17 = vld [vmem:[#allocation7 + $0xb8] sm:$0xff] }
 0x150   :  { %v492_v25 = vadd.f32 %v491_v24, %v320_v20  ;;  %v411_v26 = vadd.f32 %v410_v3, %v319_v21  ;;  %v493_v27 = vpop.f32.mrb[1].mxu1 }
 0x151   :  { %674 = vst [vmem:[#allocation8] sm:$0xff] %v409_v23  ;;  %v494_v8 = vadd.f32 %v493_v27, %v321_v22 }
 0x152   :  { %676 = vst [vmem:[#allocation8 + $0x10] sm:$0xff] %v492_v25  ;;  %675 = vst [vmem:[#allocation8 + $0x8] sm:$0xff] %v411_v26  ;;  %v414_v19 = vpop.f32.mrb[2].mxu0 }
 0x153   :  { %677 = vst [vmem:[#allocation8 + $0x18] sm:$0xff] %v494_v8  ;;  %v415_v31 = vadd.f32 %v414_v19, %v326_v18  ;;  %v497_v32 = vpop.f32.mrb[2].mxu1  ;;  %v416_v33 = vpop.f32.mrb[3].mxu0 }
 0x154   :  { %v498_v34 = vadd.f32 %v497_v32, %v328_v28  ;;  %v417_v35 = vadd.f32 %v416_v33, %v327_v29  ;;  %v499_v36 = vpop.f32.mrb[3].mxu1 }
 0x155   :  { %682 = vst [vmem:[#allocation8 + $0x40] sm:$0xff] %v415_v31  ;;  %v500_v38 = vadd.f32 %v499_v36, %v329_v30 }
 0x156   :  { %684 = vst [vmem:[#allocation8 + $0x50] sm:$0xff] %v498_v34  ;;  %683 = vst [vmem:[#allocation8 + $0x48] sm:$0xff] %v417_v35  ;;  %v420_v41 = vpop.f32.mrb[4].mxu0 }
 0x157   :  { %685 = vst [vmem:[#allocation8 + $0x58] sm:$0xff] %v500_v38  ;;  %v421_v43 = vadd.f32 %v420_v41, %v334_v37  ;;  %v503_v44 = vpop.f32.mrb[4].mxu1  ;;  %v422_v45 = vpop.f32.mrb[5].mxu0 }
 0x158   :  { %v504_v46 = vadd.f32 %v503_v44, %v336_v39  ;;  %v423_v47 = vadd.f32 %v422_v45, %v335_v40  ;;  %v505_v48 = vpop.f32.mrb[5].mxu1 }
 0x159   :  { %690 = vst [vmem:[#allocation8 + $0x80] sm:$0xff] %v421_v43  ;;  %v506_v49 = vadd.f32 %v505_v48, %v337_v42 }
 0x15a   :  { %692 = vst [vmem:[#allocation8 + $0x90] sm:$0xff] %v504_v46  ;;  %691 = vst [vmem:[#allocation8 + $0x88] sm:$0xff] %v423_v47 }
 0x15b   :  { %693 = vst [vmem:[#allocation8 + $0x98] sm:$0xff] %v506_v49 }
 0x18e   :  { %v574_v53 = vpop.f32.mrb[6].mxu0 }
 0x18f   :  { %v575_v55 = vadd.f32 %v574_v53, %v322_v50  ;;  %v657_v16 = vpop.f32.mrb[6].mxu1  ;;  %v576_v56 = vpop.f32.mrb[7].mxu0 }
 0x190   :  { %v658_v57 = vadd.f32 %v657_v16, %v324_v51  ;;  %v577_v58 = vadd.f32 %v576_v56, %v323_v52  ;;  %v659_v59 = vpop.f32.mrb[7].mxu1 }
 0x191   :  { %678 = vst [vmem:[#allocation8 + $0x20] sm:$0xff] %v575_v55  ;;  %v660_v61 = vadd.f32 %v659_v59, %v325_v54 }
 0x192   :  { %680 = vst [vmem:[#allocation8 + $0x30] sm:$0xff] %v658_v57  ;;  %679 = vst [vmem:[#allocation8 + $0x28] sm:$0xff] %v577_v58  ;;  %v580_v0 = vpop.f32.mrb[8].mxu0 }
 0x193   :  { %681 = vst [vmem:[#allocation8 + $0x38] sm:$0xff] %v660_v61  ;;  %v581_v2 = vadd.f32 %v580_v0, %v330_v60  ;;  %v663_v4 = vpop.f32.mrb[8].mxu1  ;;  %v582_v5 = vpop.f32.mrb[9].mxu0 }
 0x194   :  { %v664_v6 = vadd.f32 %v663_v4, %v332_v62  ;;  %v583_v7 = vadd.f32 %v582_v5, %v331_v63  ;;  %v665_v9 = vpop.f32.mrb[9].mxu1 }
 0x195   :  { %686 = vst [vmem:[#allocation8 + $0x60] sm:$0xff] %v581_v2  ;;  %v666_v11 = vadd.f32 %v665_v9, %v333_v1 }
 0x196   :  { %688 = vst [vmem:[#allocation8 + $0x70] sm:$0xff] %v664_v6  ;;  %687 = vst [vmem:[#allocation8 + $0x68] sm:$0xff] %v583_v7  ;;  %v586_v14 = vpop.f32.mrb[10].mxu0 }
 0x197   :  { %689 = vst [vmem:[#allocation8 + $0x78] sm:$0xff] %v666_v11  ;;  %v587_v20 = vadd.f32 %v586_v14, %v338_v10  ;;  %v669_v21 = vpop.f32.mrb[10].mxu1  ;;  %v588_v15 = vpop.f32.mrb[11].mxu0 }
 0x198   :  { %v670_v22 = vadd.f32 %v669_v21, %v340_v12  ;;  %v589_v23 = vadd.f32 %v588_v15, %v339_v13  ;;  %v671_v24 = vpop.f32.mrb[11].mxu1 }
 0x199   :  { %694 = vst [vmem:[#allocation8 + $0xa0] sm:$0xff] %v587_v20  ;;  %v672_v3 = vadd.f32 %v671_v24, %v341_v17 }
 0x19a   :  { %696 = vst [vmem:[#allocation8 + $0xb0] sm:$0xff] %v670_v22  ;;  %695 = vst [vmem:[#allocation8 + $0xa8] sm:$0xff] %v589_v23 }
 0x19b   :  { %697 = vst [vmem:[#allocation8 + $0xb8] sm:$0xff] %v672_v3 }
 0x19c   :  { %1057 = shalt.err (!%p1054_p0)
}
 0x19d   :  { %s1058_s29 = scalar_lea.hbm %s1198_s3, 3072 }
 0x19e   :  { %p1059_p1 = scmp.ne.s32.totalorder %s1198_s3, %s1058_s29  ;;  %p1062_p2 = scmp.lt.u32.totalorder %s1058_s29, %s1198_s3 }
 0x1a0   :  { %p1064_p3 = pnand %p1062_p2, %p1059_p1 }
 0x1a2   :  { %1067 = shalt.err (!%p1064_p3)
}
 0x1a3   :  { %709 = dma.vmem_to_hbm [thread:$0]  %s704_s25, 3072, %s1198_s3, [#allocation4], %s1075_s22, %s1075_s22, %s1076_s23  }
 0x1a4   :  { %1072 = dma.done.wait [#allocation4], 3072  }
 0x1a5   :  { %1073 = vsyncadd [#allocation4], 4294964224 }
 0x1a6   :  { %713 = vsyncpa [#allocation3], 1 }
 0x1a7   :  { %714 = vsyncpa [#allocation6], 1 }
 0x1a8   :  { %715 = vsyncpa [#allocation4], 1 }

</bundles_post_ra>
